<compile_context>
chip_gen: v7x
topology: tpu7x:2x2x1
jax: 0.10.0
libtpu: 0.0.40
codegen_flags: <defaults>
</compile_context>

<pallas_src>
import jax
import jax.numpy as jnp
from jax.experimental import pallas as pl
from jax.experimental.pallas import tpu as pltpu

_MIB = 1024 * 1024
# Lane-dense widths to try for the flattened 2-D view (largest first).
_LANE_CANDIDATES = (2048, 1024, 512, 256, 128)


def _copy_kernel(x_ref, emb_ref):
    # Pure pass-through: the abstract forward defines no transformation.
    emb_ref[...] = x_ref[...]


def _round_up(n, m):
    return ((n + m - 1) // m) * m


def _chip_tuning():
    """Returns (per-buffer tile bytes, vmem limit bytes, use 2-TensorCore split)."""
    try:
        kind = jax.devices()[0].device_kind.lower()
    except Exception:
        kind = ""
    if "v7" in kind:      # v7x: ~3.2 TB/s HBM, 64 MiB physical VMEM, 2 TCs/chip
        tile = 8 * _MIB
        return tile, 4 * tile + 8 * _MIB, True     # 40 MiB scoped limit
    if "v6" in kind:      # v6e: ~1.4 TB/s HBM, 128 MiB VMEM, 1 TC
        tile = 4 * _MIB
        return tile, 32 * _MIB, False
    # v5e / unknown: conservative (v5e default scoped VMEM limit is only 16 MiB).
    tile = 3 * _MIB
    return tile, 20 * _MIB, False


def base_model_forward(x):
    """Pallas stand-in for BaseModel.forward -> (predictions, embeddings).

    The abstract base class defines no transformation, so both outputs equal
    the input: `predictions` is the input array itself (no HBM round-trip);
    `embeddings` is a physically distinct buffer produced by a tiled Pallas
    identity-copy kernel streaming at ~2N bytes of HBM traffic.
    """
    orig_shape = x.shape
    n = x.size
    if n == 0:
        return x, x

    itemsize = jnp.dtype(x.dtype).itemsize
    # Sublane packing granularity: f32 -> 8, bf16 -> 16, int8/fp8 -> 32.
    sublane = {4: 8, 2: 16, 1: 32}.get(itemsize, 8)
    tile_bytes, vmem_limit, two_cores = _chip_tuning()

    # ---- choose a 2-D view (rows, width) of the data ----------------------
    # Prefer a lane-dense width (multiple of 128, as wide as possible while
    # keeping at least one full sublane group of rows).  A reshape of a
    # contiguous array is free -- no pad / slice passes.
    lanes = None
    for cand in _LANE_CANDIDATES:
        if n % cand != 0:
            continue
        if lanes is None:
            lanes = cand                       # largest divisor found so far
        if n // cand >= sublane:
            lanes = cand                       # wide *and* >= 1 sublane group
            break
    if lanes is not None:
        x2d = x.reshape(-1, lanes)
    else:
        # Element count not a multiple of 128: keep (rows, feats) and let
        # Pallas mask the boundary block (still no padding / slicing).
        feats = orig_shape[-1] if x.ndim >= 1 and orig_shape[-1] > 0 else 1
        x2d = x.reshape(-1, feats)
    rows, width = x2d.shape

    # ---- row tiling --------------------------------------------------------
    row_bytes = max(1, width * itemsize)
    if rows <= sublane:
        tile_rows = rows                       # block dim == full dim (legal)
    else:
        budget_rows = max(sublane, (tile_bytes // row_bytes) // sublane * sublane)
        tile_rows = min(budget_rows, (rows // sublane) * sublane)
    grid_rows = pl.cdiv(rows, tile_rows)

    # v7x only: make sure both TensorCores get work when everything would
    # otherwise land in a single grid step.
    if two_cores and grid_rows == 1 and rows >= 2 * sublane:
        tile_rows = min(_round_up(pl.cdiv(rows, 2), sublane),
                        (rows // sublane) * sublane)
        grid_rows = pl.cdiv(rows, tile_rows)

    spec = pl.BlockSpec((tile_rows, width), lambda i: (i, 0))
    emb2d = pl.pallas_call(
        _copy_kernel,
        grid=(grid_rows,),
        in_specs=[spec],
        out_specs=spec,
        out_shape=jax.ShapeDtypeStruct((rows, width), x.dtype),
        compiler_params=pltpu.CompilerParams(
            dimension_semantics=("parallel",),
            vmem_limit_bytes=vmem_limit,
        ),
    )(x2d)

    embeddings = emb2d.reshape(orig_shape)
    predictions = x   # identity; avoids a redundant HBM read + write
    return predictions, embeddings


if __name__ == "__main__":
    key = jax.random.PRNGKey(0)
    # Small synthetic input (batch=2, channels=4, 16x16 spatial); the 2048
    # elements flatten to a lane-dense (8, 256) view -- no padding, no slicing.
    x = jax.random.normal(key, (2, 4, 16, 16), dtype=jnp.float32)

    preds, embs = base_model_forward(x)
    jax.block_until_ready((preds, embs))

    # Sanity: abstract forward implies identity pass-through in this stand-in.
    assert preds.shape == x.shape and embs.shape == x.shape
    assert bool(jnp.allclose(preds, x)) and bool(jnp.allclose(embs, x))

    print("KERNEL_OK")
</pallas_src>

<mosaic_0001>
module attributes {stable_mosaic.version = 11 : i64} {
  func.func @_copy_kernel(%arg0: i32, %arg1: memref<8x256xf32, #tpu.memory_space<vmem>>, %arg2: memref<8x256xf32, #tpu.memory_space<vmem>>) attributes {dimension_semantics = [#tpu.dimension_semantics<parallel>], iteration_bounds = array<i64: 1>, scalar_prefetch = 0 : i64, scratch_operands = 0 : i64, tpu.core_type = #tpu.core_type<tc>, window_params = [{transform_indices = @transform_0, window_bounds = array<i64: 8, 256>}, {transform_indices = @transform_1, window_bounds = array<i64: 8, 256>}]} {
    %c0 = arith.constant 0 : index
    %c0_0 = arith.constant 0 : index
    %0 = vector.load %arg1[%c0, %c0_0] : memref<8x256xf32, #tpu.memory_space<vmem>>, vector<8x256xf32>
    %c0_1 = arith.constant 0 : index
    %c0_2 = arith.constant 0 : index
    %1 = vector.load %arg2[%c0_1, %c0_2] : memref<8x256xf32, #tpu.memory_space<vmem>>, vector<8x256xf32>
    tpu.vector_store %arg2[%c0_1, %c0_2], %0 {strides = array<i32>} : memref<8x256xf32, #tpu.memory_space<vmem>>, vector<8x256xf32>,
    return
  }
  func.func @transform_0(%arg0: i32) -> (i32, i32) {
    %c0_i32 = arith.constant 0 : i32
    %c0_i32_0 = arith.constant 0 : i32
    return %arg0, %c0_i32 : i32, i32
  }
  func.func @transform_1(%arg0: i32) -> (i32, i32) {
    %c0_i32 = arith.constant 0 : i32
    %c0_i32_0 = arith.constant 0 : i32
    return %arg0, %c0_i32 : i32, i32
  }
}

</mosaic_0001>

<bundles_post_ra>
// kernel: tpu_custom_call.1
= control target key start
LH: loop header
LB: loop body
LE: loop exit
PB: predicated region body
PF: predicated region fallthrough
CT: control target
= control target key end

     0   :  { %6 = vsyncpa [#allocation3], 0  ;;  %s126_s0 = inlined_call_operand.hbm [shape: f32[8,256], index: 0, kind: input, shape index: {}]   ;;  %s127_s1 = inlined_call_operand.hbm [shape: f32[8,256], index: 1, kind: output, shape index: {}]  }
   0x1   :  { %7 = vsyncpa [#allocation4], 0  ;;  %s90_s6 = smov [#allocation2]   ;;  %s42_s10 = scalar_lea.hbm %s126_s0, 256 }
   0x2   :  { %s14_s7 = sshll.u32 %s90_s6, 4  ;;  %p43_p0 = scmp.ne.s32.totalorder %s126_s0, %s42_s10  ;;  %s15_s7 = int_to_ptr.vmem [resolvable:$true] %s14_s7 }
   0x3   :  { %p46_p1 = scmp.lt.u32.totalorder %s42_s10, %s126_s0 }
   0x5   :  { %p48_p2 = pnand %p46_p1, %p43_p0 }
   0x7   :  { %51 = shalt.err (!%p48_p2)
}
   0x8   :  { %s52_s15 = scalar_lea.vmem %s15_s7, 256  ;;  %p57_p4 = scmp.lt.s32.totalorder %s15_s7, %s15_s7 }
   0x9   :  { %p53_p3 = scmp.ne.s32.totalorder %s15_s7, %s52_s15  ;;  %p58_p5 = scmp.lt.s32.totalorder %s52_s15, %s52_s15 }
   0xb   :  { %p59_p6 = por %p58_p5, %p57_p4 }
   0xd   :  { %p60_p7 = pnand %p59_p6, %p53_p3 }
   0xf   :  { %63 = shalt.err (!%p60_p7)
}
  0x10   :  { %17 = dma.hbm_to_vmem [thread:$0]  %s126_s0, 256, %s15_s7, [#allocation3]  }
  0x11   :  { %86 = dma.done.wait [#allocation3], 256  }
  0x12   :  { %87 = vsyncadd [#allocation3], 4294967040  ;;  %s91_s18 = smov [#allocation5]   ;;  %v21_v0 = vld [vmem:[#allocation2] sm:$0xff]  ;;  %v22_v1 = vld [vmem:[#allocation2 + $0x8] sm:$0xff] }
  0x13   :  { %s31_s19 = sshll.u32 %s91_s18, 4  ;;  %23 = vst [vmem:[#allocation5] sm:$0xff] %v21_v0  ;;  %24 = vst [vmem:[#allocation5 + $0x8] sm:$0xff] %v22_v1  ;;  %s32_s19 = int_to_ptr.vmem [resolvable:$true] %s31_s19 }
  0x14   :  { %s64_s20 = scalar_lea.vmem %s32_s19, 256  ;;  %p69_p9 = scmp.lt.s32.totalorder %s32_s19, %s32_s19 }
  0x15   :  { %p65_p8 = scmp.ne.s32.totalorder %s32_s19, %s64_s20  ;;  %p70_p10 = scmp.lt.s32.totalorder %s64_s20, %s64_s20 }
  0x17   :  { %p71_p11 = por %p70_p10, %p69_p9 }
  0x19   :  { %p72_p12 = pnand %p71_p11, %p65_p8 }
  0x1b   :  { %75 = shalt.err (!%p72_p12)
}
  0x1c   :  { %s76_s0 = scalar_lea.hbm %s127_s1, 256 }
  0x1d   :  { %p77_p13 = scmp.ne.s32.totalorder %s127_s1, %s76_s0  ;;  %p80_p0 = scmp.lt.u32.totalorder %s76_s0, %s127_s1 }
  0x1f   :  { %p82_p1 = pnand %p80_p0, %p77_p13 }
  0x21   :  { %85 = shalt.err (!%p82_p1)
}
  0x22   :  { %34 = dma.vmem_to_hbm [thread:$0]  %s32_s19, 256, %s127_s1, [#allocation4]  }
  0x23   :  { %88 = dma.done.wait [#allocation4], 256  }
  0x24   :  { %89 = vsyncadd [#allocation4], 4294967040 }
  0x25   :  { %38 = vsyncpa [#allocation3], 1 }
  0x26   :  { %39 = vsyncpa [#allocation4], 1 }

</bundles_post_ra>
